<compile_context>
chip_gen: v7x
topology: tpu7x:2x2x1
jax: 0.10.0
libtpu: 0.0.40
codegen_flags: <defaults>
</compile_context>

<pallas_src>
import functools

import jax
import jax.numpy as jnp
from jax.experimental import pallas as pl
from jax.experimental.pallas import tpu as pltpu


def _rmsnorm_kernel(x_ref, w_ref, o_ref, *, eps, inv_c):
    # x_ref: (row_tile, C), w_ref: (1, C), o_ref: (row_tile, C)
    # Pass 1: f32 accumulation for the row-wise mean-square (matches x.float()).
    xf = x_ref[...].astype(jnp.float32)
    ss = jnp.sum(xf * xf, axis=-1, keepdims=True)          # cross-lane reduce (XLU)
    inv = jax.lax.rsqrt(ss * inv_c + eps)                  # 1/C folded into a constant mul
    w = w_ref[...].astype(jnp.float32)                     # (1, C) broadcasts over rows
    # Pass 2: re-read the native-dtype tile from VMEM instead of keeping the f32 upcast
    # live across the reduction (a 4 MiB bf16 tile would need an 8 MiB f32 temp, which
    # cannot sit in 64 vregs and would spill; re-loading uses vld slots, not vst slots).
    o_ref[...] = ((x_ref[...].astype(jnp.float32) * inv) * w).astype(o_ref.dtype)


def _sublane_pack(dtype):
    # f32 -> 8, bf16/f16 -> 16, int8/fp8 -> 32 rows per packed vreg tile
    return max(8, 32 // jnp.dtype(dtype).itemsize)


def _vmem_capacity_bytes():
    # Trace-time hardware query; fall back to 128 MiB (v5e/v6e) if unavailable.
    try:
        return int(pltpu.get_tpu_info().vmem_capacity_bytes)
    except Exception:
        return 128 * 2**20


def _pick_row_tile(rows, C, dtype, target_tile_bytes):
    itemsize = jnp.dtype(dtype).itemsize
    pack = _sublane_pack(dtype)
    rows_padded = ((rows + pack - 1) // pack) * pack
    # Cap by bytes only (no fixed max_rows) so small-C shapes still reach the tile target.
    t = max(pack, target_tile_bytes // max(1, C * itemsize))
    t = min(t, rows_padded)
    t = max(pack, (t // pack) * pack)
    return int(t)


def wan_rms_norm(x, weight, eps=1e-5, *, row_tile=None):
    """x: [B, L, C], weight: [C]. Returns same shape/dtype as x."""
    B, L, C = x.shape
    rows = B * L
    x2 = x.reshape(rows, C)
    w2 = weight.reshape(1, C)

    vmem_cap = _vmem_capacity_bytes()
    # v5e/v6e (128 MiB VMEM): 4 MiB IO tiles; v7x (64 MiB): 2 MiB IO tiles.
    target_tile_bytes = 4 * 2**20 if vmem_cap >= 96 * 2**20 else 2 * 2**20

    pack = _sublane_pack(x.dtype)
    if row_tile is None:
        row_tile = _pick_row_tile(rows, C, x.dtype, target_tile_bytes)
    else:
        row_tile = max(pack, (int(row_tile) // pack) * pack)

    # Partial last block is handled by Pallas (rows are independent, padded writes dropped).
    grid = (pl.cdiv(rows, row_tile),)

    itemsize = jnp.dtype(x.dtype).itemsize
    tile_bytes = row_tile * C * itemsize
    # 2x double-buffered input + 2x double-buffered output tiles (native dtype)
    # + ~2 tile-sized f32 temps for the upcast chains + headroom; clamp to ~72% of
    # physical VMEM so compiler scratch / DMA descriptors still fit (esp. v7x 64 MiB).
    vmem_limit = 4 * tile_bytes + 2 * row_tile * C * 4 + (2 << 20)
    vmem_limit = int(min(max(vmem_limit, 32 * 2**20), int(0.72 * vmem_cap)))

    # Deeper buffering only pays when per-tile DMA is latency- rather than
    # bandwidth-dominated (small tiles, long grid); essentially free after the f32-temp cut.
    if tile_bytes <= 512 * 1024 and grid[0] >= 4:
        act_spec = pl.BlockSpec((row_tile, C), lambda i: (i, 0),
                                pipeline_mode=pl.Buffered(3))
    else:
        act_spec = pl.BlockSpec((row_tile, C), lambda i: (i, 0))

    kernel = functools.partial(_rmsnorm_kernel, eps=float(eps), inv_c=1.0 / float(C))

    out = pl.pallas_call(
        kernel,
        out_shape=jax.ShapeDtypeStruct((rows, C), x.dtype),
        grid_spec=pltpu.PrefetchScalarGridSpec(
            num_scalar_prefetch=0,
            grid=grid,
            in_specs=[
                act_spec,                                   # activations
                pl.BlockSpec((1, C), lambda i: (0, 0)),     # weight, constant block
            ],
            out_specs=pl.BlockSpec((row_tile, C), lambda i: (i, 0)),
        ),
        compiler_params=pltpu.CompilerParams(
            dimension_semantics=("parallel",),
            vmem_limit_bytes=vmem_limit,
        ),
    )(x2, w2)

    return out.reshape(B, L, C)


def wan_rms_norm_ref(x, weight, eps=1e-5):
    xf = x.astype(jnp.float32)
    ms = jnp.mean(xf * xf, axis=-1, keepdims=True)
    return ((xf * jax.lax.rsqrt(ms + eps)) * weight.astype(jnp.float32)).astype(x.dtype)


if __name__ == "__main__":
    key = jax.random.PRNGKey(0)

    # ---- test 1: small f32 shape matching the module's [B, L, C] contract ----
    B, L, C = 2, 8, 32
    kx, kw, kx2, kw2 = jax.random.split(key, 4)
    x = jax.random.normal(kx, (B, L, C), dtype=jnp.float32)
    # module __init__ uses ones(dim); perturb deterministically so the test is non-trivial
    weight = jnp.ones((C,), dtype=jnp.float32) + 0.01 * jax.random.normal(kw, (C,), dtype=jnp.float32)

    y = jax.block_until_ready(wan_rms_norm(x, weight, eps=1e-5))
    y_ref = wan_rms_norm_ref(x, weight, eps=1e-5)
    assert y.shape == x.shape and y.dtype == x.dtype
    assert jnp.allclose(y, y_ref, atol=1e-5, rtol=1e-5), "f32 mismatch vs reference"

    # ---- test 2: bf16, multiple grid steps with a partial last block (rows % tile != 0) ----
    B2, L2, C2 = 2, 100, 256          # rows = 200, row_tile = 128 -> grid of 2, last block partial
    x_b = jax.random.normal(kx2, (B2, L2, C2), dtype=jnp.float32).astype(jnp.bfloat16)
    w_b = (jnp.ones((C2,), dtype=jnp.float32)
           + 0.01 * jax.random.normal(kw2, (C2,), dtype=jnp.float32)).astype(jnp.bfloat16)

    y_b = jax.block_until_ready(wan_rms_norm(x_b, w_b, eps=1e-5, row_tile=128))
    y_b_ref = wan_rms_norm_ref(x_b, w_b, eps=1e-5)
    assert y_b.shape == x_b.shape and y_b.dtype == x_b.dtype
    assert jnp.allclose(y_b.astype(jnp.float32), y_b_ref.astype(jnp.float32),
                        atol=2e-2, rtol=2e-2), "bf16 mismatch vs reference"

    # ---- test 3: small-C (per-head-style) bf16 shape through the default byte-capped tiler ----
    B3, L3, C3 = 2, 512, 128
    kx3 = jax.random.fold_in(key, 3)
    x_h = jax.random.normal(kx3, (B3, L3, C3), dtype=jnp.float32).astype(jnp.bfloat16)
    w_h = jnp.ones((C3,), dtype=jnp.bfloat16)
    y_h = jax.block_until_ready(wan_rms_norm(x_h, w_h, eps=1e-5))
    y_h_ref = wan_rms_norm_ref(x_h, w_h, eps=1e-5)
    assert jnp.allclose(y_h.astype(jnp.float32), y_h_ref.astype(jnp.float32),
                        atol=2e-2, rtol=2e-2), "small-C bf16 mismatch vs reference"

    print("KERNEL_OK")
</pallas_src>

<mosaic_0001>
module attributes {stable_mosaic.version = 11 : i64} {
  func.func @_rmsnorm_kernel(%arg0: i32, %arg1: memref<16x32xf32, #tpu.memory_space<vmem>>, %arg2: memref<1x32xf32, #tpu.memory_space<vmem>>, %arg3: memref<16x32xf32, #tpu.memory_space<vmem>>) attributes {dimension_semantics = [#tpu.dimension_semantics<parallel>], iteration_bounds = array<i64: 1>, scalar_prefetch = 0 : i64, scratch_operands = 0 : i64, tpu.core_type = #tpu.core_type<tc>, window_params = [{transform_indices = @transform_0, window_bounds = array<i64: 16, 32>}, {pipeline_mode = #tpu.pipeline_mode<synchronous>, transform_indices = @transform_1, window_bounds = array<i64: 1, 32>}, {transform_indices = @transform_2, window_bounds = array<i64: 16, 32>}]} {
    %c0 = arith.constant 0 : index
    %c0_0 = arith.constant 0 : index
    %0 = vector.load %arg1[%c0, %c0_0] : memref<16x32xf32, #tpu.memory_space<vmem>>, vector<16x32xf32>
    %1 = arith.mulf %0, %0 : vector<16x32xf32>
    %cst = arith.constant dense<0.000000e+00> : vector<16xf32>
    %2 = vector.multi_reduction <add>, %1, %cst [1] : vector<16x32xf32> to vector<16xf32>
    %3 = vector.shape_cast %2 : vector<16xf32> to vector<16x1xf32>
    %cst_1 = arith.constant 3.125000e-02 : f32
    %4 = vector.broadcast %cst_1 : f32 to vector<16x1xf32>
    %5 = arith.mulf %3, %4 : vector<16x1xf32>
    %cst_2 = arith.constant 9.99999974E-6 : f32
    %6 = vector.broadcast %cst_2 : f32 to vector<16x1xf32>
    %7 = arith.addf %5, %6 : vector<16x1xf32>
    %8 = math.rsqrt %7 : vector<16x1xf32>
    %c0_3 = arith.constant 0 : index
    %c0_4 = arith.constant 0 : index
    %9 = vector.load %arg2[%c0_3, %c0_4] : memref<1x32xf32, #tpu.memory_space<vmem>>, vector<1x32xf32>
    %c0_5 = arith.constant 0 : index
    %c0_6 = arith.constant 0 : index
    %10 = vector.load %arg1[%c0_5, %c0_6] : memref<16x32xf32, #tpu.memory_space<vmem>>, vector<16x32xf32>
    %11 = vector.broadcast %8 : vector<16x1xf32> to vector<16x32xf32>
    %12 = arith.mulf %10, %11 : vector<16x32xf32>
    %13 = vector.broadcast %9 : vector<1x32xf32> to vector<16x32xf32>
    %14 = arith.mulf %12, %13 : vector<16x32xf32>
    %c0_7 = arith.constant 0 : index
    %c0_8 = arith.constant 0 : index
    %15 = vector.load %arg3[%c0_7, %c0_8] : memref<16x32xf32, #tpu.memory_space<vmem>>, vector<16x32xf32>
    tpu.vector_store %arg3[%c0_7, %c0_8], %14 {strides = array<i32>} : memref<16x32xf32, #tpu.memory_space<vmem>>, vector<16x32xf32>,
    return
  }
  func.func @transform_0(%arg0: i32) -> (i32, i32) {
    %c0_i32 = arith.constant 0 : i32
    %c0_i32_0 = arith.constant 0 : i32
    return %arg0, %c0_i32 : i32, i32
  }
  func.func @transform_1(%arg0: i32) -> (i32, i32) {
    %c0_i32 = arith.constant 0 : i32
    %c0_i32_0 = arith.constant 0 : i32
    %c0_i32_1 = arith.constant 0 : i32
    return %c0_i32, %c0_i32_0 : i32, i32
  }
  func.func @transform_2(%arg0: i32) -> (i32, i32) {
    %c0_i32 = arith.constant 0 : i32
    %c0_i32_0 = arith.constant 0 : i32
    return %arg0, %c0_i32 : i32, i32
  }
}

</mosaic_0001>

<bundles_post_ra>
// kernel: tpu_custom_call.1
= control target key start
LH: loop header
LB: loop body
LE: loop exit
PB: predicated region body
PF: predicated region fallthrough
CT: control target
= control target key end

     0   :  { %7 = vsyncpa [#allocation3], 0  ;;  %s186_s0 = inlined_call_operand.hbm [shape: f32[16,32], index: 0, kind: input, shape index: {}]   ;;  %s187_s1 = inlined_call_operand.vmem [shape: f32[1,32], index: 1, kind: input, shape index: {}]   ;;  %s188_s2 = inlined_call_operand.hbm [shape: f32[16,32], index: 2, kind: output, shape index: {}]  }
   0x1   :  { %8 = vsyncpa [#allocation4], 0  ;;  %s130_s9 = smov [#allocation2]   ;;  %s82_s13 = scalar_lea.hbm %s186_s0, 256 }
   0x2   :  { %s14_s10 = sshll.u32 %s130_s9, 4  ;;  %p83_p0 = scmp.ne.s32.totalorder %s186_s0, %s82_s13  ;;  %s15_s10 = int_to_ptr.vmem [resolvable:$true] %s14_s10 }
   0x3   :  { %p86_p1 = scmp.lt.u32.totalorder %s82_s13, %s186_s0 }
   0x5   :  { %p88_p2 = pnand %p86_p1, %p83_p0 }
   0x7   :  { %91 = shalt.err (!%p88_p2)
}
   0x8   :  { %s92_s18 = scalar_lea.vmem %s15_s10, 256  ;;  %p97_p4 = scmp.lt.s32.totalorder %s15_s10, %s15_s10 }
   0x9   :  { %p93_p3 = scmp.ne.s32.totalorder %s15_s10, %s92_s18  ;;  %p98_p5 = scmp.lt.s32.totalorder %s92_s18, %s92_s18 }
   0xb   :  { %p99_p6 = por %p98_p5, %p97_p4 }
   0xd   :  { %p100_p7 = pnand %p99_p6, %p93_p3 }
   0xf   :  { %103 = shalt.err (!%p100_p7)
}
  0x10   :  { %s131_s19 = smov 128   ;;  %s132_s20 = smov 8  }
  0x11   :  { %20 = dma.hbm_to_vmem [thread:$0]  %s186_s0, 256, %s15_s10, [#allocation3], %s131_s19, %s131_s19, %s132_s20  }
  0x12   :  { %126 = dma.done.wait [#allocation3], 256  }
  0x13   :  { %127 = vsyncadd [#allocation3], 4294967040  ;;  %v26_v0 = vld [vmem:[#allocation2] sm:$0xff]  ;;  %vm30_vm0 = vcmask 261120   ;;  %v27_v1 = vld [vmem:[#allocation2 + $0x8] sm:$0xff]  ;;  %s133_s24 = smov [#allocation5]  }
  0x14   :  { %v28_v2 = vmul.f32 %v26_v0, %v26_v0  ;;  %v29_v3 = vmul.f32 %v27_v1, %v27_v1  ;;  %v73_v13 = vld [vmem:[%s187_s1] ss:$0 sm:$0xff]  ;;  %s61_s25 = sshll.u32 %s133_s24, 4  ;;  %s62_s25 = int_to_ptr.vmem [resolvable:$true] %s61_s25 }
  0x15   :  { %s104_s26 = scalar_lea.vmem %s62_s25, 256  ;;  %p109_p9 = scmp.lt.s32.totalorder %s62_s25, %s62_s25 }
  0x16   :  { %v31_v4 = vsel %vm30_vm0, %v28_v2, 0.0  ;;  %v34_v5 = vsel %vm30_vm0, %v29_v3, 0.0  ;;  %p105_p8 = scmp.ne.s32.totalorder %s62_s25, %s104_s26  ;;  %p110_p10 = scmp.lt.s32.totalorder %s104_s26, %s104_s26 }
  0x17   :  { %32 = vadd.xlane.f32.xlu0 %v31_v4 }
  0x18   :  { %p111_p11 = por %p110_p10, %p109_p9 }
  0x1a   :  { %p112_p12 = pnand %p111_p11, %p105_p8 }
  0x1b   :  { %35 = vadd.xlane.f32.xlu0 %v34_v5 }
  0xa4   :  { %v33_v6 = vpop.xlane.xlu0 %32 }
  0xa5   :  { %v37_v7 = vmul.f32 0.03125, %v33_v6 }
  0xa7   :  { %v39_v8 = vadd.f32 1e-05, %v37_v7 }
  0xa8   :  { %v36_v9 = vpop.xlane.xlu0 %35 }
  0xa9   :  { %78 = vrsqrt.f32 %v39_v8  ;;  %v38_v10 = vmul.f32 0.03125, %v36_v9 }
  0xab   :  { %v40_v11 = vadd.f32 1e-05, %v38_v10 }
  0xad   :  { %80 = vrsqrt.f32 %v40_v11 }
  0xb3   :  { %v79_v12 = vpop.eup %78 }
  0xb4   :  { %v44_v14 = vmul.f32 %v79_v12, %v26_v0 }
  0xb6   :  { %v52_v15 = vmul.f32 %v73_v13, %v44_v14 }
  0xb7   :  { %v81_v16 = vpop.eup %80 }
  0xb8   :  { %v45_v17 = vmul.f32 %v81_v16, %v27_v1  ;;  %54 = vst.msk [vmem:[#allocation5] sm:$0xff] %vm30_vm0, %v52_v15 }
  0xba   :  { %v53_v18 = vmul.f32 %v73_v13, %v45_v17 }
  0xbc   :  { %55 = vst.msk [vmem:[#allocation5 + $0x8] sm:$0xff] %vm30_vm0, %v53_v18 }
  0xbd   :  { %115 = shalt.err (!%p112_p12)
}
  0xbe   :  { %s116_s28 = scalar_lea.hbm %s188_s2, 256 }
  0xbf   :  { %p117_p13 = scmp.ne.s32.totalorder %s188_s2, %s116_s28  ;;  %p120_p0 = scmp.lt.u32.totalorder %s116_s28, %s188_s2 }
  0xc1   :  { %p122_p1 = pnand %p120_p0, %p117_p13 }
  0xc3   :  { %125 = shalt.err (!%p122_p1)
}
  0xc4   :  { %67 = dma.vmem_to_hbm [thread:$0]  %s62_s25, 256, %s188_s2, [#allocation4], %s131_s19, %s131_s19, %s132_s20  }
  0xc5   :  { %128 = dma.done.wait [#allocation4], 256  }
  0xc6   :  { %129 = vsyncadd [#allocation4], 4294967040 }
  0xc7   :  { %71 = vsyncpa [#allocation3], 1 }
  0xc8   :  { %72 = vsyncpa [#allocation4], 1 }

</bundles_post_ra>
